<compile_context>
chip_gen: v5e
topology: v5e:2x2
jax: 0.10.0
libtpu: 0.0.40
codegen_flags: <defaults>
</compile_context>

<pallas_src>
import functools

import jax
import jax.numpy as jnp
from jax.experimental import pallas as pl
from jax.experimental.pallas import tpu as pltpu


def _sdl_kernel(x_ref, a_ref, b_ref, coshd_ref, lsinhd_ref, out_ref, *, C):
    """One (hw_tile, batch) grid step.

    x_ref:      (1, C, HW_T)  input pixels for this batch element / HW tile
    a_ref:      (C, O, HW_T)  a      = inv_scale / inv_width   (x coefficient)
    b_ref:      (C, O, HW_T)  b      = mean * inv_scale
    coshd_ref:  (C, O, HW_T)  cosh(d),       d = 0.5 * inv_scale / inv_width
    lsinhd_ref: (C, O, HW_T)  log(sinh(d))
    out_ref:    (1, O, HW_T)  sum over C of the per-element log-probability
    """
    x_blk = x_ref[...].astype(jnp.float32)            # (1, C, HW_T)

    acc = None
    # Static unroll over the small input-channel axis: only (O, HW_T)-sized
    # temporaries are live at any time.
    for c in range(C):
        xc = x_blk[0, c][None, :]                      # (1, HW_T)
        a = a_ref[c]                                   # (O, HW_T)
        b = b_ref[c]
        cosh_d = coshd_ref[c]
        log_sinh_d = lsinhd_ref[c]

        m = xc * a - b                                 # midpoint argument
        am = jnp.abs(m)
        t = jnp.exp(-am)                               # EUP #1
        # log(cosh(m) + cosh(d)) = |m| + log(0.5*(1 + t^2) + cosh(d)*t)
        log_denom = am + jnp.log(0.5 + 0.5 * t * t + cosh_d * t)   # EUP #2
        prob = log_sinh_d - log_denom                  # log(sig(m+d) - sig(m-d))
        prob = jnp.where(jnp.isnan(prob), 0.0, prob)   # torch: NaN -> 0 before sum

        acc = prob if acc is None else acc + prob

    out_ref[0] = acc                                   # (O, HW_T) dense store


def _pick_hw_tile(hw, max_tile=2048):
    """Largest multiple-of-128 divisor of hw that is <= max_tile (else hw)."""
    if hw <= max_tile or hw % 128 != 0:
        return hw
    for cand in range(max_tile, 127, -128):
        if hw % cand == 0:
            return cand
    return hw


def spatial_discrete_logistic_forward(x, mean, log_scale, inv_width=256):
    """x: (B, C, H, W); mean/log_scale: (O, C, H, W) -> (B, O, H, W) float32."""
    B, C, H, W = x.shape
    O = mean.shape[0]
    HW = H * W
    f32 = jnp.float32
    inv_w = float(inv_width)

    # ---- batch-independent parameter precompute (plain XLA, done once) ----
    inv_scale = jnp.exp(-log_scale.astype(f32))        # 1 / exp(log_scale)
    d = (0.5 / inv_w) * inv_scale                      # half-bin width / scale
    a = inv_scale * (1.0 / inv_w)                      # coefficient of x
    b = mean.astype(f32) * inv_scale
    cosh_d = jnp.cosh(d)
    # stable log(sinh(d)) = d + log(1 - exp(-2d)) - log(2)
    log_sinh_d = d + jnp.log(-jnp.expm1(-2.0 * d)) - jnp.log(2.0)

    def to_param_layout(p):                            # (O,C,H,W) -> (C,O,HW)
        return jnp.transpose(p.reshape(O, C, HW), (1, 0, 2))

    a2, b2, cd2, ls2 = map(to_param_layout, (a, b, cosh_d, log_sinh_d))
    x2 = x.reshape(B, C, HW)                           # keep original dtype

    hw_t = _pick_hw_tile(HW)
    n_hw = HW // hw_t

    # ---- VMEM budget: params x double buffer + x/out tiles + live temps ----
    param_bytes = 4 * C * O * hw_t * 4 * 2
    io_bytes = 2 * (C * hw_t * x.dtype.itemsize + O * hw_t * 4)
    temp_bytes = 6 * O * hw_t * 4
    vmem_limit = int(min(max(int((param_bytes + io_bytes + temp_bytes) * 1.5),
                             16 << 20), 48 << 20))

    kernel = functools.partial(_sdl_kernel, C=C)

    out = pl.pallas_call(
        kernel,
        out_shape=jax.ShapeDtypeStruct((B, O, HW), jnp.float32),
        grid=(n_hw, B),                                # B innermost: param tiles reused
        in_specs=[
            pl.BlockSpec((1, C, hw_t), lambda h, i: (i, 0, h)),   # x
            pl.BlockSpec((C, O, hw_t), lambda h, i: (0, 0, h)),   # a  (resident per hw tile)
            pl.BlockSpec((C, O, hw_t), lambda h, i: (0, 0, h)),   # b
            pl.BlockSpec((C, O, hw_t), lambda h, i: (0, 0, h)),   # cosh(d)
            pl.BlockSpec((C, O, hw_t), lambda h, i: (0, 0, h)),   # log(sinh(d))
        ],
        out_specs=pl.BlockSpec((1, O, hw_t), lambda h, i: (i, 0, h)),
        compiler_params=pltpu.CompilerParams(
            dimension_semantics=("parallel", "parallel"),
            vmem_limit_bytes=vmem_limit,
        ),
    )(x2, a2, b2, cd2, ls2)

    return out.reshape(B, O, H, W)


def _reference_forward(x, mean, log_scale, inv_width=256):
    """Pure-JAX mirror of the PyTorch forward (original formula) for verification."""
    xb = x[:, None].astype(jnp.float32) / inv_width           # (B,1,C,H,W)
    scale = jnp.exp(log_scale)[None]                           # (1,O,C,H,W)
    m = mean[None]
    a = jax.nn.log_sigmoid((xb + 0.5 / inv_width - m) / scale)
    b = jax.nn.log_sigmoid((xb - 0.5 / inv_width - m) / scale)
    prob = a + jnp.log(1.0 - jnp.exp(b - a) + 1e-8)
    prob = jnp.where(jnp.isnan(prob), 0.0, prob)
    return jnp.sum(prob, axis=2)                               # (B,O,H,W)


if __name__ == "__main__":
    key = jax.random.PRNGKey(0)
    k_x, k_mean, k_ls = jax.random.split(key, 3)

    # Module config: in_size = (C, H, W), out_channels = O, inverse_width = 256
    B, C, H, W = 2, 4, 16, 16
    O = 8
    INV_WIDTH = 256

    # Deterministic parameter init mirroring torch.rand (uniform [0, 1))
    mean = jax.random.uniform(k_mean, (O, C, H, W), dtype=jnp.float32)
    log_scale = jax.random.uniform(k_ls, (O, C, H, W), dtype=jnp.float32)

    # Example input: pixel-like values in [0, inv_width)
    x = jax.random.uniform(
        k_x, (B, C, H, W), dtype=jnp.float32, minval=0.0, maxval=float(INV_WIDTH)
    )

    out = spatial_discrete_logistic_forward(x, mean, log_scale, INV_WIDTH)
    out = jax.block_until_ready(out)

    ref = _reference_forward(x, mean, log_scale, INV_WIDTH)
    assert out.shape == (B, O, H, W)
    # Tolerance note: the reference evaluates 1 - exp(lb - la) with lb ~ la
    # (catastrophic cancellation, ~1e-3-level absolute error on the C-summed
    # f32 result); the kernel's algebraically fused sinh/cosh form is more
    # accurate but therefore differs from the f32 reference by up to a few e-3
    # on outputs of magnitude ~30 (the dropped 1e-8 epsilon adds ~1e-4).
    assert jnp.allclose(out, ref, atol=1e-3, rtol=5e-4), (
        float(jnp.max(jnp.abs(out - ref)))
    )

    print("KERNEL_OK")
</pallas_src>

<mosaic_0001>
module attributes {stable_mosaic.version = 11 : i64} {
  func.func @_sdl_kernel(%arg0: i32, %arg1: i32, %arg2: memref<1x4x256xf32, #tpu.memory_space<vmem>>, %arg3: memref<4x8x256xf32, #tpu.memory_space<vmem>>, %arg4: memref<4x8x256xf32, #tpu.memory_space<vmem>>, %arg5: memref<4x8x256xf32, #tpu.memory_space<vmem>>, %arg6: memref<4x8x256xf32, #tpu.memory_space<vmem>>, %arg7: memref<1x8x256xf32, #tpu.memory_space<vmem>>) attributes {dimension_semantics = [#tpu.dimension_semantics<parallel>, #tpu.dimension_semantics<parallel>], iteration_bounds = array<i64: 1, 2>, scalar_prefetch = 0 : i64, scratch_operands = 0 : i64, tpu.core_type = #tpu.core_type<tc>, window_params = [{transform_indices = @transform_0, window_bounds = array<i64: 1, 4, 256>}, {transform_indices = @transform_1, window_bounds = array<i64: 4, 8, 256>}, {transform_indices = @transform_2, window_bounds = array<i64: 4, 8, 256>}, {transform_indices = @transform_3, window_bounds = array<i64: 4, 8, 256>}, {transform_indices = @transform_4, window_bounds = array<i64: 4, 8, 256>}, {transform_indices = @transform_5, window_bounds = array<i64: 1, 8, 256>}]} {
    %c0 = arith.constant 0 : index
    %c0_0 = arith.constant 0 : index
    %c0_1 = arith.constant 0 : index
    %0 = vector.load %arg2[%c0, %c0_0, %c0_1] : memref<1x4x256xf32, #tpu.memory_space<vmem>>, vector<1x4x256xf32>
    %1 = vector.extract_strided_slice %0 {offsets = [0, 0, 0], sizes = [1, 1, 256], strides = [1, 1, 1]} : vector<1x4x256xf32> to vector<1x1x256xf32>
    %2 = vector.shape_cast %1 : vector<1x1x256xf32> to vector<256xf32>
    %3 = vector.shape_cast %2 : vector<256xf32> to vector<1x256xf32>
    %c0_2 = arith.constant 0 : index
    %c0_3 = arith.constant 0 : index
    %c0_4 = arith.constant 0 : index
    %4 = vector.load %arg3[%c0_2, %c0_3, %c0_4] : memref<4x8x256xf32, #tpu.memory_space<vmem>>, vector<1x8x256xf32>
    %5 = vector.shape_cast %4 : vector<1x8x256xf32> to vector<8x256xf32>
    %c0_5 = arith.constant 0 : index
    %c0_6 = arith.constant 0 : index
    %c0_7 = arith.constant 0 : index
    %6 = vector.load %arg4[%c0_5, %c0_6, %c0_7] : memref<4x8x256xf32, #tpu.memory_space<vmem>>, vector<1x8x256xf32>
    %7 = vector.shape_cast %6 : vector<1x8x256xf32> to vector<8x256xf32>
    %c0_8 = arith.constant 0 : index
    %c0_9 = arith.constant 0 : index
    %c0_10 = arith.constant 0 : index
    %8 = vector.load %arg5[%c0_8, %c0_9, %c0_10] : memref<4x8x256xf32, #tpu.memory_space<vmem>>, vector<1x8x256xf32>
    %9 = vector.shape_cast %8 : vector<1x8x256xf32> to vector<8x256xf32>
    %c0_11 = arith.constant 0 : index
    %c0_12 = arith.constant 0 : index
    %c0_13 = arith.constant 0 : index
    %10 = vector.load %arg6[%c0_11, %c0_12, %c0_13] : memref<4x8x256xf32, #tpu.memory_space<vmem>>, vector<1x8x256xf32>
    %11 = vector.shape_cast %10 : vector<1x8x256xf32> to vector<8x256xf32>
    %12 = vector.broadcast %3 : vector<1x256xf32> to vector<8x256xf32>
    %13 = arith.mulf %12, %5 : vector<8x256xf32>
    %14 = arith.subf %13, %7 : vector<8x256xf32>
    %15 = math.absf %14 : vector<8x256xf32>
    %cst = arith.constant 0.000000e+00 : f32
    %16 = vector.broadcast %cst : f32 to vector<8x256xf32>
    %17 = arith.subf %16, %15 : vector<8x256xf32>
    %18 = math.exp %17 : vector<8x256xf32>
    %cst_14 = arith.constant 5.000000e-01 : f32
    %19 = vector.broadcast %cst_14 : f32 to vector<8x256xf32>
    %20 = arith.mulf %19, %18 : vector<8x256xf32>
    %21 = arith.mulf %20, %18 : vector<8x256xf32>
    %cst_15 = arith.constant 5.000000e-01 : f32
    %22 = vector.broadcast %cst_15 : f32 to vector<8x256xf32>
    %23 = arith.addf %22, %21 : vector<8x256xf32>
    %24 = arith.mulf %9, %18 : vector<8x256xf32>
    %25 = arith.addf %23, %24 : vector<8x256xf32>
    %26 = math.log %25 : vector<8x256xf32>
    %27 = arith.addf %15, %26 : vector<8x256xf32>
    %28 = arith.subf %11, %27 : vector<8x256xf32>
    %29 = arith.cmpf one, %28, %28 : vector<8x256xf32>
    %cst_16 = arith.constant 0.000000e+00 : f32
    %30 = vector.broadcast %cst_16 : f32 to vector<8x256xf32>
    %31 = arith.select %29, %30, %28 : vector<8x256xi1>, vector<8x256xf32>
    %32 = vector.extract_strided_slice %0 {offsets = [0, 1, 0], sizes = [1, 1, 256], strides = [1, 1, 1]} : vector<1x4x256xf32> to vector<1x1x256xf32>
    %33 = vector.shape_cast %32 : vector<1x1x256xf32> to vector<256xf32>
    %34 = vector.shape_cast %33 : vector<256xf32> to vector<1x256xf32>
    %c1 = arith.constant 1 : index
    %c0_17 = arith.constant 0 : index
    %c0_18 = arith.constant 0 : index
    %35 = vector.load %arg3[%c1, %c0_17, %c0_18] : memref<4x8x256xf32, #tpu.memory_space<vmem>>, vector<1x8x256xf32>
    %36 = vector.shape_cast %35 : vector<1x8x256xf32> to vector<8x256xf32>
    %c1_19 = arith.constant 1 : index
    %c0_20 = arith.constant 0 : index
    %c0_21 = arith.constant 0 : index
    %37 = vector.load %arg4[%c1_19, %c0_20, %c0_21] : memref<4x8x256xf32, #tpu.memory_space<vmem>>, vector<1x8x256xf32>
    %38 = vector.shape_cast %37 : vector<1x8x256xf32> to vector<8x256xf32>
    %c1_22 = arith.constant 1 : index
    %c0_23 = arith.constant 0 : index
    %c0_24 = arith.constant 0 : index
    %39 = vector.load %arg5[%c1_22, %c0_23, %c0_24] : memref<4x8x256xf32, #tpu.memory_space<vmem>>, vector<1x8x256xf32>
    %40 = vector.shape_cast %39 : vector<1x8x256xf32> to vector<8x256xf32>
    %c1_25 = arith.constant 1 : index
    %c0_26 = arith.constant 0 : index
    %c0_27 = arith.constant 0 : index
    %41 = vector.load %arg6[%c1_25, %c0_26, %c0_27] : memref<4x8x256xf32, #tpu.memory_space<vmem>>, vector<1x8x256xf32>
    %42 = vector.shape_cast %41 : vector<1x8x256xf32> to vector<8x256xf32>
    %43 = vector.broadcast %34 : vector<1x256xf32> to vector<8x256xf32>
    %44 = arith.mulf %43, %36 : vector<8x256xf32>
    %45 = arith.subf %44, %38 : vector<8x256xf32>
    %46 = math.absf %45 : vector<8x256xf32>
    %cst_28 = arith.constant 0.000000e+00 : f32
    %47 = vector.broadcast %cst_28 : f32 to vector<8x256xf32>
    %48 = arith.subf %47, %46 : vector<8x256xf32>
    %49 = math.exp %48 : vector<8x256xf32>
    %cst_29 = arith.constant 5.000000e-01 : f32
    %50 = vector.broadcast %cst_29 : f32 to vector<8x256xf32>
    %51 = arith.mulf %50, %49 : vector<8x256xf32>
    %52 = arith.mulf %51, %49 : vector<8x256xf32>
    %cst_30 = arith.constant 5.000000e-01 : f32
    %53 = vector.broadcast %cst_30 : f32 to vector<8x256xf32>
    %54 = arith.addf %53, %52 : vector<8x256xf32>
    %55 = arith.mulf %40, %49 : vector<8x256xf32>
    %56 = arith.addf %54, %55 : vector<8x256xf32>
    %57 = math.log %56 : vector<8x256xf32>
    %58 = arith.addf %46, %57 : vector<8x256xf32>
    %59 = arith.subf %42, %58 : vector<8x256xf32>
    %60 = arith.cmpf one, %59, %59 : vector<8x256xf32>
    %cst_31 = arith.constant 0.000000e+00 : f32
    %61 = vector.broadcast %cst_31 : f32 to vector<8x256xf32>
    %62 = arith.select %60, %61, %59 : vector<8x256xi1>, vector<8x256xf32>
    %63 = arith.addf %31, %62 : vector<8x256xf32>
    %64 = vector.extract_strided_slice %0 {offsets = [0, 2, 0], sizes = [1, 1, 256], strides = [1, 1, 1]} : vector<1x4x256xf32> to vector<1x1x256xf32>
    %65 = vector.shape_cast %64 : vector<1x1x256xf32> to vector<256xf32>
    %66 = vector.shape_cast %65 : vector<256xf32> to vector<1x256xf32>
    %c2 = arith.constant 2 : index
    %c0_32 = arith.constant 0 : index
    %c0_33 = arith.constant 0 : index
    %67 = vector.load %arg3[%c2, %c0_32, %c0_33] : memref<4x8x256xf32, #tpu.memory_space<vmem>>, vector<1x8x256xf32>
    %68 = vector.shape_cast %67 : vector<1x8x256xf32> to vector<8x256xf32>
    %c2_34 = arith.constant 2 : index
    %c0_35 = arith.constant 0 : index
    %c0_36 = arith.constant 0 : index
    %69 = vector.load %arg4[%c2_34, %c0_35, %c0_36] : memref<4x8x256xf32, #tpu.memory_space<vmem>>, vector<1x8x256xf32>
    %70 = vector.shape_cast %69 : vector<1x8x256xf32> to vector<8x256xf32>
    %c2_37 = arith.constant 2 : index
    %c0_38 = arith.constant 0 : index
    %c0_39 = arith.constant 0 : index
    %71 = vector.load %arg5[%c2_37, %c0_38, %c0_39] : memref<4x8x256xf32, #tpu.memory_space<vmem>>, vector<1x8x256xf32>
    %72 = vector.shape_cast %71 : vector<1x8x256xf32> to vector<8x256xf32>
    %c2_40 = arith.constant 2 : index
    %c0_41 = arith.constant 0 : index
    %c0_42 = arith.constant 0 : index
    %73 = vector.load %arg6[%c2_40, %c0_41, %c0_42] : memref<4x8x256xf32, #tpu.memory_space<vmem>>, vector<1x8x256xf32>
    %74 = vector.shape_cast %73 : vector<1x8x256xf32> to vector<8x256xf32>
    %75 = vector.broadcast %66 : vector<1x256xf32> to vector<8x256xf32>
    %76 = arith.mulf %75, %68 : vector<8x256xf32>
    %77 = arith.subf %76, %70 : vector<8x256xf32>
    %78 = math.absf %77 : vector<8x256xf32>
    %cst_43 = arith.constant 0.000000e+00 : f32
    %79 = vector.broadcast %cst_43 : f32 to vector<8x256xf32>
    %80 = arith.subf %79, %78 : vector<8x256xf32>
    %81 = math.exp %80 : vector<8x256xf32>
    %cst_44 = arith.constant 5.000000e-01 : f32
    %82 = vector.broadcast %cst_44 : f32 to vector<8x256xf32>
    %83 = arith.mulf %82, %81 : vector<8x256xf32>
    %84 = arith.mulf %83, %81 : vector<8x256xf32>
    %cst_45 = arith.constant 5.000000e-01 : f32
    %85 = vector.broadcast %cst_45 : f32 to vector<8x256xf32>
    %86 = arith.addf %85, %84 : vector<8x256xf32>
    %87 = arith.mulf %72, %81 : vector<8x256xf32>
    %88 = arith.addf %86, %87 : vector<8x256xf32>
    %89 = math.log %88 : vector<8x256xf32>
    %90 = arith.addf %78, %89 : vector<8x256xf32>
    %91 = arith.subf %74, %90 : vector<8x256xf32>
    %92 = arith.cmpf one, %91, %91 : vector<8x256xf32>
    %cst_46 = arith.constant 0.000000e+00 : f32
    %93 = vector.broadcast %cst_46 : f32 to vector<8x256xf32>
    %94 = arith.select %92, %93, %91 : vector<8x256xi1>, vector<8x256xf32>
    %95 = arith.addf %63, %94 : vector<8x256xf32>
    %96 = vector.extract_strided_slice %0 {offsets = [0, 3, 0], sizes = [1, 1, 256], strides = [1, 1, 1]} : vector<1x4x256xf32> to vector<1x1x256xf32>
    %97 = vector.shape_cast %96 : vector<1x1x256xf32> to vector<256xf32>
    %98 = vector.shape_cast %97 : vector<256xf32> to vector<1x256xf32>
    %c3 = arith.constant 3 : index
    %c0_47 = arith.constant 0 : index
    %c0_48 = arith.constant 0 : index
    %99 = vector.load %arg3[%c3, %c0_47, %c0_48] : memref<4x8x256xf32, #tpu.memory_space<vmem>>, vector<1x8x256xf32>
    %100 = vector.shape_cast %99 : vector<1x8x256xf32> to vector<8x256xf32>
    %c3_49 = arith.constant 3 : index
    %c0_50 = arith.constant 0 : index
    %c0_51 = arith.constant 0 : index
    %101 = vector.load %arg4[%c3_49, %c0_50, %c0_51] : memref<4x8x256xf32, #tpu.memory_space<vmem>>, vector<1x8x256xf32>
    %102 = vector.shape_cast %101 : vector<1x8x256xf32> to vector<8x256xf32>
    %c3_52 = arith.constant 3 : index
    %c0_53 = arith.constant 0 : index
    %c0_54 = arith.constant 0 : index
    %103 = vector.load %arg5[%c3_52, %c0_53, %c0_54] : memref<4x8x256xf32, #tpu.memory_space<vmem>>, vector<1x8x256xf32>
    %104 = vector.shape_cast %103 : vector<1x8x256xf32> to vector<8x256xf32>
    %c3_55 = arith.constant 3 : index
    %c0_56 = arith.constant 0 : index
    %c0_57 = arith.constant 0 : index
    %105 = vector.load %arg6[%c3_55, %c0_56, %c0_57] : memref<4x8x256xf32, #tpu.memory_space<vmem>>, vector<1x8x256xf32>
    %106 = vector.shape_cast %105 : vector<1x8x256xf32> to vector<8x256xf32>
    %107 = vector.broadcast %98 : vector<1x256xf32> to vector<8x256xf32>
    %108 = arith.mulf %107, %100 : vector<8x256xf32>
    %109 = arith.subf %108, %102 : vector<8x256xf32>
    %110 = math.absf %109 : vector<8x256xf32>
    %cst_58 = arith.constant 0.000000e+00 : f32
    %111 = vector.broadcast %cst_58 : f32 to vector<8x256xf32>
    %112 = arith.subf %111, %110 : vector<8x256xf32>
    %113 = math.exp %112 : vector<8x256xf32>
    %cst_59 = arith.constant 5.000000e-01 : f32
    %114 = vector.broadcast %cst_59 : f32 to vector<8x256xf32>
    %115 = arith.mulf %114, %113 : vector<8x256xf32>
    %116 = arith.mulf %115, %113 : vector<8x256xf32>
    %cst_60 = arith.constant 5.000000e-01 : f32
    %117 = vector.broadcast %cst_60 : f32 to vector<8x256xf32>
    %118 = arith.addf %117, %116 : vector<8x256xf32>
    %119 = arith.mulf %104, %113 : vector<8x256xf32>
    %120 = arith.addf %118, %119 : vector<8x256xf32>
    %121 = math.log %120 : vector<8x256xf32>
    %122 = arith.addf %110, %121 : vector<8x256xf32>
    %123 = arith.subf %106, %122 : vector<8x256xf32>
    %124 = arith.cmpf one, %123, %123 : vector<8x256xf32>
    %cst_61 = arith.constant 0.000000e+00 : f32
    %125 = vector.broadcast %cst_61 : f32 to vector<8x256xf32>
    %126 = arith.select %124, %125, %123 : vector<8x256xi1>, vector<8x256xf32>
    %127 = arith.addf %95, %126 : vector<8x256xf32>
    %c0_62 = arith.constant 0 : index
    %c0_63 = arith.constant 0 : index
    %c0_64 = arith.constant 0 : index
    %128 = vector.load %arg7[%c0_62, %c0_63, %c0_64] : memref<1x8x256xf32, #tpu.memory_space<vmem>>, vector<1x8x256xf32>
    %129 = vector.shape_cast %128 : vector<1x8x256xf32> to vector<8x256xf32>
    %130 = vector.shape_cast %127 : vector<8x256xf32> to vector<1x8x256xf32>
    tpu.vector_store %arg7[%c0_62, %c0_63, %c0_64], %130 {strides = array<i32>} : memref<1x8x256xf32, #tpu.memory_space<vmem>>, vector<1x8x256xf32>,
    return
  }
  func.func @transform_0(%arg0: i32, %arg1: i32) -> (i32, i32, i32) {
    %c0_i32 = arith.constant 0 : i32
    %c0_i32_0 = arith.constant 0 : i32
    return %arg1, %c0_i32, %arg0 : i32, i32, i32
  }
  func.func @transform_1(%arg0: i32, %arg1: i32) -> (i32, i32, i32) {
    %c0_i32 = arith.constant 0 : i32
    %c0_i32_0 = arith.constant 0 : i32
    %c0_i32_1 = arith.constant 0 : i32
    return %c0_i32, %c0_i32_0, %arg0 : i32, i32, i32
  }
  func.func @transform_2(%arg0: i32, %arg1: i32) -> (i32, i32, i32) {
    %c0_i32 = arith.constant 0 : i32
    %c0_i32_0 = arith.constant 0 : i32
    %c0_i32_1 = arith.constant 0 : i32
    return %c0_i32, %c0_i32_0, %arg0 : i32, i32, i32
  }
  func.func @transform_3(%arg0: i32, %arg1: i32) -> (i32, i32, i32) {
    %c0_i32 = arith.constant 0 : i32
    %c0_i32_0 = arith.constant 0 : i32
    %c0_i32_1 = arith.constant 0 : i32
    return %c0_i32, %c0_i32_0, %arg0 : i32, i32, i32
  }
  func.func @transform_4(%arg0: i32, %arg1: i32) -> (i32, i32, i32) {
    %c0_i32 = arith.constant 0 : i32
    %c0_i32_0 = arith.constant 0 : i32
    %c0_i32_1 = arith.constant 0 : i32
    return %c0_i32, %c0_i32_0, %arg0 : i32, i32, i32
  }
  func.func @transform_5(%arg0: i32, %arg1: i32) -> (i32, i32, i32) {
    %c0_i32 = arith.constant 0 : i32
    %c0_i32_0 = arith.constant 0 : i32
    return %arg1, %c0_i32, %arg0 : i32, i32, i32
  }
}

</mosaic_0001>

<bundles_post_ra>
// kernel: tpu_custom_call.1
= control target key start
LH: loop header
LB: loop body
LE: loop exit
PB: predicated region body
PF: predicated region fallthrough
CT: control target
= control target key end

     0   :  { %10 = vsyncpa [#allocation3], 0  ;;  %s1367_s0 = inlined_call_operand.hbm [shape: f32[2,4,256], index: 0, kind: input, shape index: {}]   ;;  %s1368_s1 = inlined_call_operand.hbm [shape: f32[4,8,256], index: 1, kind: input, shape index: {}]   ;;  %s1369_s2 = inlined_call_operand.hbm [shape: f32[4,8,256], index: 2, kind: input, shape index: {}]   ;;  %s1370_s3 = inlined_call_operand.hbm [shape: f32[4,8,256], index: 3, kind: input, shape index: {}]   ;;  %s1371_s4 = inlined_call_operand.hbm [shape: f32[4,8,256], index: 4, kind: input, shape index: {}]   ;;  %s1372_s5 = inlined_call_operand.hbm [shape: f32[2,8,256], index: 5, kind: output, shape index: {}]  }
   0x1   :  { %12 = vsyncpa [#allocation3 + $0x1], 0 }
   0x2   :  { %13 = vsyncpa [#allocation6], 0 }
   0x3   :  { %14 = vsyncpa [#allocation9], 0 }
   0x4   :  { %15 = vsyncpa [#allocation4], 0 }
   0x5   :  { %17 = vsyncpa [#allocation4 + $0x1], 0  ;;  %s1168_s18 = smov 0   ;;  %s1170_s19 = smov 0  }
   0x6   :  { %s1172_s20 = smov 0   ;;  %s1174_s21 = smov 0  }
   0x7   :  { %s1176_s22 = smov 0   ;;  %s1178_s23 = smov 0  }
   0x8 LB: > { %s728_s24 = sadd.s32 4294967295, %s1130_s23   ;;  %p730_p0 = scmp.ge.s32.totalorder %s1130_s23, 1  ;;  %s1130_s23 = sphi %s1178_s23, %s23_s23   ;;  %s1126_s22 = sphi %s1176_s22, %s1383_s22   ;;  %s1122_s21 = sphi %s1174_s21, %s1382_s21   ;;  %s1118_s20 = sphi %s1172_s20, %s1381_s20   ;;  %s1114_s19 = sphi %s1170_s19, %s1380_s19   ;;  %s1110_s18 = sphi %s1168_s18, %s1379_s18  }
   0x9   : > { %p1202_p1 = scmp.eq.s32.totalorder %s728_s24, 0  ;;  %p200_p2 = scmp.lt.s32.totalorder %s1130_s23, 3 }
   0xa   : > { %s214_s28 = sshll.u32 %s1368_s1, 4  ;;  %s1132_s30 = smov [#allocation5]   ;;  %s215_s28 = int_to_ptr.hbm [resolvable:$true] %s214_s28 }
   0xb   : > { %p1210_p3 = pnand %p730_p0, %p200_p2  ;;  %s216_s6 = sshll.u32 %s1132_s30, 4  ;;  %s217_s6 = int_to_ptr.vmem [resolvable:$true] %s216_s6 }
   0xc   : > { %p735_p6 = scmp.ge.s32.totalorder %s1130_s23, 2  ;;  %s248_s10 = sshll.u32 %s1370_s3, 4  ;;  %s249_s10 = int_to_ptr.hbm [resolvable:$true] %s248_s10 }
   0xd   : > { %p773_p4 = pneg %p1210_p3  ;;  %s1133_s11 = smov 256  }
   0xe   : > { %s1134_s12 = smov 16   ;;  %s1135_s13 = smov [#allocation8]  }
   0xf   : > { %p1218_p5 = pnand %p773_p4, %p1202_p1  ;;  %s250_s14 = sshll.u32 %s1135_s13, 4  ;;  %s251_s14 = int_to_ptr.vmem [resolvable:$true] %s250_s14 }
  0x10   : > { %s231_s17 = sshll.u32 %s1369_s2, 4  ;;  %s1136_s30 = smov [#allocation7]   ;;  %s232_s17 = int_to_ptr.hbm [resolvable:$true] %s231_s17 }
  0x11   : > { %776 = dma.hbm_to_vmem [thread:$0]  (!%p1218_p5), %s215_s28, 1024, %s217_s6, [#allocation6], %s1133_s11, %s1133_s11, %s1134_s12  }
  0x12   : > { %782 = dma.hbm_to_vmem [thread:$0]  (!%p1218_p5), %s249_s10, 1024, %s251_s14, [#allocation9], %s1133_s11, %s1133_s11, %s1134_s12  }
  0x13   : > { %s265_s28 = sshll.u32 %s1371_s4, 4  ;;  %s233_s6 = sshll.u32 %s1136_s30, 4  ;;  %s266_s28 = int_to_ptr.hbm [resolvable:$true] %s265_s28  ;;  %s234_s6 = int_to_ptr.vmem [resolvable:$true] %s233_s6 }
  0x14   : > { %779 = dma.hbm_to_vmem [thread:$0]  (!%p1218_p5), %s232_s17, 1024, %s234_s6, [#allocation6], %s1133_s11, %s1133_s11, %s1134_s12  }
  0x15   : > { %s1137_s8 = smov [#allocation10]   ;;  %s32_s10 = sadd.s32 1, %s1126_s22 }
  0x16   : > { %s267_s9 = sshll.u32 %s1137_s8, 4  ;;  %s729_s13 = sadd.s32 4294967294, %s1130_s23   ;;  %s268_s9 = int_to_ptr.vmem [resolvable:$true] %s267_s9 }
  0x17   : > { %785 = dma.hbm_to_vmem [thread:$0]  (!%p1218_p5), %s266_s28, 1024, %s268_s9, [#allocation9], %s1133_s11, %s1133_s11, %s1134_s12  }
  0x18   : > { %p33_p7 = scmp.ge.s32.totalorder %s32_s10, 2  ;;  %s44_s14 = sadd.s32 1, %s1118_s20 }
  0x19   : > { %p51_p8 = scmp.ne.s32.totalorder %s1118_s20, %s1114_s19  ;;  %p52_p9 = scmp.eq.s32.totalorder %s1130_s23, 0 }
  0x1a   : > { %s1385_s10 = smov (%p33_p7, %s32_s10), 0  ;;  %p57_p10 = scmp.ne.s32.totalorder %s1114_s19, %s1110_s18 }
  0x1b   : > { %s39_s15 = ssub.s32 %s1126_s22, %s1385_s10  ;;  %p187_p11 = scmp.eq.s32.totalorder %s728_s24, 1 }
  0x1c   : > { %p42_p12 = scmp.eq.s32.totalorder %s39_s15, 0  ;;  %p1256_p13 = por %p1202_p1, %p57_p10 }
  0x1d   : > { %p1260_p0 = por %p187_p11, %p51_p8  ;;  %p193_p2 = scmp.eq.s32.totalorder %s729_s13, 1 }
  0x1e   : > { %s1265_s12 = scalar_select %p42_p12, %s1118_s20, %s44_s14  }
  0x1f   : > { %p53_p4 = por %p52_p9, %p51_p8  ;;  %p1267_p5 = por %p193_p2, %p57_p10 }
  0x20   : > { %s281_s17 = sand.u32 1, %s1118_s20   ;;  %s751_s24 = sshll.u32 %s1126_s22, 3 }
  0x21   : > { %p798_p7 = scmp.lt.s32.totalorder %s1130_s23, 2  ;;  %s736_s26 = sshll.u32 %s281_s17, 3 }
  0x22   : > { %s292_s30 = scalar_lea.hbm %s1367_s0, %s751_s24  ;;  %s285_s8 = scalar_lea.vmem [#allocation2], %s736_s26 }
  0x23   : > { %s294_s6 = sshll.u32 %s292_s30, 4  ;;  %s296_s9 = sshll.u32 %s285_s8, 4  ;;  %s295_s6 = int_to_ptr.hbm [resolvable:$true] %s294_s6  ;;  %s297_s9 = int_to_ptr.vmem [resolvable:$true] %s296_s9 }
  0x24   : > { %p787_p11 = pnand %p798_p7, %p53_p4  ;;  %s282_s13 = scalar_lea.sflag [#allocation3], %s281_s17 }
  0x25   : > { %305 = sbr.rel (%p1210_p3) target bundleno = 107 (0x6b), region = 40  ;;  %s1280_s14 = sand.u32 (!%p1210_p3), 1, %s1114_s19  }
  0x26   : > { %789 = dma.hbm_to_vmem [thread:$0]  (!%p787_p11), %s295_s6, 128, %s297_s9, %s282_s13  }
  0x27   : > { %s740_s15 = sshll.u32 (!%p1210_p3), %s1280_s14, 3  ;;  %s308_s27 = scalar_lea.sflag (!%p1210_p3), [#allocation3], %s1280_s14 }
  0x28   : > { %s311_s24 = scalar_lea.vmem (!%p1210_p3), [#allocation2], %s740_s15 }
  0x2a   : > { %1093 = dma.done.wait (%p1256_p13), %s308_s27, 128  }
  0x2b   : > { %1095 = vsyncadd (%p1256_p13), %s308_s27, 4294967168 }
  0x2c   : > { %1097 = dma.done.wait (%p1202_p1), [#allocation6], 2048  }
  0x2d   : > { %1099 = vsyncadd (%p1202_p1), [#allocation6], 4294965248 }
  0x2e   : > { %1101 = dma.done.wait (%p1202_p1), [#allocation9], 2048  }
  0x2f   : > { %1103 = vsyncadd (%p1202_p1), [#allocation9], 4294965248  ;;  %v365_v0 = vld [vmem:[%s311_s24] sm:$0xff]  ;;  %v366_v4 = vld [vmem:[#allocation5] sm:$0xff]  ;;  %s745_s25 = sshll.u32 %s1280_s14, 4  ;;  %s752_s29 = sshll.u32 %s1122_s21, 4 }
  0x30   : > { %v375_v1 = vperm.slane %v365_v0, 0  ;;  %v427_v2 = vperm.slane %v365_v0, 1  ;;  %v481_v3 = vperm.slane %v365_v0, 2  ;;  %v416_v5 = vld [vmem:[#allocation5 + $0x10] sm:$0xff]  ;;  %v470_v6 = vld [vmem:[#allocation5 + $0x20] sm:$0xff]  ;;  %v535_v7 = vperm.slane %v365_v0, 3  ;;  %s593_s26 = scalar_lea.hbm %s1372_s5, %s752_s29 }
  0x31   : > { %v376_v8 = vperm.slane %v365_v0, 4  ;;  %v428_v9 = vperm.slane %v365_v0, 5  ;;  %v368_v10 = vld [vmem:[#allocation7] sm:$0xff]  ;;  %v524_v14 = vld [vmem:[#allocation5 + $0x30] sm:$0xff]  ;;  %v367_v18 = vld [vmem:[#allocation5 + $0x8] sm:$0xff]  ;;  %v482_v27 = vperm.slane %v365_v0, 6 }
  0x32   : > { %v379_v11 = vperm.slane %v375_v1, 0  ;;  %v431_v12 = vperm.slane %v427_v2, 1  ;;  %v485_v13 = vperm.slane %v481_v3, 2  ;;  %v419_v15 = vld [vmem:[#allocation7 + $0x10] sm:$0xff]  ;;  %v473_v16 = vld [vmem:[#allocation7 + $0x20] sm:$0xff]  ;;  %v539_v17 = vperm.slane %v535_v7, 3 }
  0x33   : > { %v380_v19 = vperm.slane %v376_v8, 0  ;;  %v432_v20 = vperm.slane %v428_v9, 1  ;;  %v527_v24 = vld [vmem:[#allocation7 + $0x30] sm:$0xff]  ;;  %v369_v25 = vld [vmem:[#allocation7 + $0x8] sm:$0xff]  ;;  %v417_v26 = vld [vmem:[#allocation5 + $0x18] sm:$0xff]  ;;  %v536_v33 = vperm.slane %v365_v0, 7 }
  0x34   : > { %v381_v21 = vmul.f32 %v379_v11, %v366_v4  ;;  %v433_v22 = vmul.f32 %v431_v12, %v416_v5  ;;  %v487_v23 = vmul.f32 %v485_v13, %v470_v6  ;;  %v541_v28 = vmul.f32 %v539_v17, %v524_v14  ;;  %v420_v30 = vld [vmem:[#allocation7 + $0x18] sm:$0xff]  ;;  %v471_v32 = vld [vmem:[#allocation5 + $0x28] sm:$0xff]  ;;  %v422_v11 = vld [vmem:[#allocation8 + $0x10] sm:$0xff]  ;;  %s358_s21 = scalar_lea.vmem [#allocation11], %s745_s25  ;;  %s597_s30 = sshll.u32 %s593_s26, 4  ;;  %s598_s30 = int_to_ptr.hbm [resolvable:$true] %s597_s30 }
  0x35   : > { %v382_v29 = vmul.f32 %v380_v19, %v367_v18  ;;  %v434_v31 = vmul.f32 %v432_v20, %v417_v26  ;;  %v486_v37 = vperm.slane %v482_v27, 2  ;;  %v525_v38 = vld [vmem:[#allocation5 + $0x38] sm:$0xff]  ;;  %v474_v42 = vld [vmem:[#allocation7 + $0x28] sm:$0xff]  ;;  %v540_v44 = vperm.slane %v536_v33, 3  ;;  %v476_v14 = vld [vmem:[#allocation8 + $0x20] sm:$0xff]  ;;  %s595_s28 = sshll.u32 %s358_s21, 4  ;;  %s596_s28 = int_to_ptr.vmem [resolvable:$true] %s595_s28 }
  0x36   : > { %v383_v34 = vsub.f32 %v381_v21, %v368_v10  ;;  %v435_v35 = vsub.f32 %v433_v22, %v419_v15  ;;  %v489_v36 = vsub.f32 %v487_v23, %v473_v16  ;;  %v543_v39 = vsub.f32 %v541_v28, %v527_v24  ;;  %v528_v43 = vld [vmem:[#allocation7 + $0x38] sm:$0xff]  ;;  %v370_v10 = vld [vmem:[#allocation8] sm:$0xff]  ;;  %v530_v15 = vld [vmem:[#allocation8 + $0x30] sm:$0xff]  ;;  %s580_s6 = scalar_lea.sflag [#allocation4], %s1280_s14  ;;  %s1054_s8 = sshra.s32 %s598_s30, 4  ;;  %s1055_s8 = int_to_ptr.hbm [resolvable:$true] %s1054_s8 }
  0x37   : > { %v384_v40 = vsub.f32 %v382_v29, %v369_v25  ;;  %v436_v41 = vsub.f32 %v434_v31, %v420_v30  ;;  %v488_v48 = vmul.f32 %v486_v37, %v471_v32  ;;  %v542_v51 = vmul.f32 %v540_v44, %v525_v38  ;;  %v371_v18 = vld [vmem:[#allocation8 + $0x8] sm:$0xff]  ;;  %v423_v24 = vld [vmem:[#allocation8 + $0x18] sm:$0xff]  ;;  %s1056_s9 = scalar_lea.hbm %s1055_s8, 16  ;;  %s1060_s27 = scalar_lea.hbm %s1372_s5, 32 }
  0x38   : > { %v1296_v45 = vand.u32 2147483647, %v383_v34  ;;  %v1298_v46 = vand.u32 2147483647, %v435_v35  ;;  %v1300_v47 = vand.u32 2147483647, %v489_v36  ;;  %p1057_p1 = scmp.ne.s32.totalorder %s1055_s8, %s1056_s9  ;;  %p1061_p9 = scmp.lt.s32.totalorder %s1055_s8, %s1372_s5 }
  0x39   : > { %v1302_v49 = vand.u32 2147483647, %v543_v39  ;;  %v1304_v50 = vand.u32 2147483647, %v384_v40  ;;  %v1309_v55 = vand.u32 2147483647, %v436_v41  ;;  %v490_v58 = vsub.f32 %v488_v48, %v474_v42  ;;  %p1062_p10 = scmp.lt.s32.totalorder %s1060_s27, %s1056_s9 }
  0x3a   : > { %v387_v52 = vsub.f32 0.0, %v1296_v45  ;;  %v439_v53 = vsub.f32 0.0, %v1298_v46  ;;  %v493_v54 = vsub.f32 0.0, %v1300_v47  ;;  %v544_v59 = vsub.f32 %v542_v51, %v528_v43  ;;  %v477_v35 = vld [vmem:[#allocation8 + $0x28] sm:$0xff]  ;;  %p1058_p3 = pnand %p1057_p1, %p1260_p0 }
  0x3b   : > { %v547_v56 = vsub.f32 0.0, %v1302_v49  ;;  %v388_v57 = vsub.f32 0.0, %v1304_v50  ;;  %v440_v0 = vsub.f32 0.0, %v1309_v55  ;;  %v1314_v2 = vand.u32 2147483647, %v490_v58  ;;  %p1063_p12 = por %p1062_p10, %p1061_p9 }
  0x3c   : > { %v389_v60 = vmul.f32 1.442695, %v387_v52  ;;  %v441_v61 = vmul.f32 1.442695, %v439_v53  ;;  %v495_v62 = vmul.f32 1.442695, %v493_v54  ;;  %p1059_p8 = pneg %p1058_p3 }
  0x3d   : > { %v549_v63 = vmul.f32 1.442695, %v547_v56  ;;  %v391_v1 = vmul.f32 1.442695, %v388_v57  ;;  %v1316_v3 = vand.u32 2147483647, %v544_v59 }
  0x3e   : > { %858 = vpow2.f32 %v389_v60  ;;  %v443_v4 = vmul.f32 1.442695, %v440_v0  ;;  %v494_v5 = vsub.f32 0.0, %v1314_v2  ;;  %v531_v59 = vld [vmem:[#allocation8 + $0x38] sm:$0xff]  ;;  %p1064_p13 = pnand %p1063_p12, %p1059_p8 }
  0x3f   : > { %860 = vpow2.f32 %v441_v61  ;;  %v548_v6 = vsub.f32 0.0, %v1316_v3 }
  0x40   : > { %862 = vpow2.f32 %v495_v62  ;;  %v497_v7 = vmul.f32 1.442695, %v494_v5 }
  0x41   : > { %864 = vpow2.f32 %v549_v63  ;;  %v551_v8 = vmul.f32 1.442695, %v548_v6 }
  0x42   : > { %866 = vpow2.f32 %v391_v1 }
  0x43   : > { %868 = vpow2.f32 %v443_v4 }
  0x44   : > { %v859_v9 = vpop.eup %858  ;;  %870 = vpow2.f32 %v497_v7 }
  0x45   : > { %v861_v12 = vpop.eup %860  ;;  %v393_v13 = vmul.f32 0.5, %v859_v9  ;;  %872 = vpow2.f32 %v551_v8  ;;  %v399_v21 = vmul.f32 %v859_v9, %v370_v10 }
  0x46   : > { %v863_v16 = vpop.eup %862  ;;  %v445_v17 = vmul.f32 0.5, %v861_v12  ;;  %v451_v22 = vmul.f32 %v861_v12, %v422_v11 }
  0x47   : > { %v865_v19 = vpop.eup %864  ;;  %v395_v20 = vmul.f32 %v859_v9, %v393_v13  ;;  %v499_v23 = vmul.f32 0.5, %v863_v16  ;;  %v505_v27 = vmul.f32 %v863_v16, %v476_v14  ;;  %v372_v13 = vld [vmem:[#allocation10] sm:$0xff] }
  0x48   : > { %v867_v25 = vpop.eup %866  ;;  %v447_v26 = vmul.f32 %v861_v12, %v445_v17  ;;  %v553_v28 = vmul.f32 0.5, %v865_v19  ;;  %v559_v29 = vmul.f32 %v865_v19, %v530_v15  ;;  %v425_v17 = vld [vmem:[#allocation10 + $0x10] sm:$0xff] }
  0x49   : > { %v869_v30 = vpop.eup %868  ;;  %v397_v31 = vadd.f32 0.5, %v395_v20  ;;  %v501_v32 = vmul.f32 %v863_v16, %v499_v23  ;;  %v394_v33 = vmul.f32 0.5, %v867_v25  ;;  %v400_v34 = vmul.f32 %v867_v25, %v371_v18 }
  0x4a   : > { %v871_v36 = vpop.eup %870  ;;  %v449_v37 = vadd.f32 0.5, %v447_v26  ;;  %v555_v38 = vmul.f32 %v865_v19, %v553_v28  ;;  %v446_v39 = vmul.f32 0.5, %v869_v30  ;;  %v452_v40 = vmul.f32 %v869_v30, %v423_v24  ;;  %v533_v26 = vld [vmem:[#allocation10 + $0x30] sm:$0xff] }
  0x4b   : > { %v873_v41 = vpop.eup %872  ;;  %v401_v42 = vadd.f32 %v399_v21, %v397_v31  ;;  %v503_v43 = vadd.f32 0.5, %v501_v32  ;;  %v396_v44 = vmul.f32 %v867_v25, %v394_v33  ;;  %v500_v48 = vmul.f32 0.5, %v871_v36  ;;  %v479_v21 = vld [vmem:[#allocation10 + $0x20] sm:$0xff]  ;;  %v373_v31 = vld [vmem:[#allocation10 + $0x8] sm:$0xff] }
  0x4c   : > { %v453_v51 = vadd.f32 %v451_v22, %v449_v37  ;;  %v557_v52 = vadd.f32 0.5, %v555_v38  ;;  %v448_v53 = vmul.f32 %v869_v30, %v446_v39  ;;  %v506_v54 = vmul.f32 %v871_v36, %v477_v35  ;;  %v480_v37 = vld [vmem:[#allocation10 + $0x28] sm:$0xff] }
  0x4d   : > { %874 = vlog2.f32 %v401_v42  ;;  %v507_v56 = vadd.f32 %v505_v27, %v503_v43  ;;  %v398_v57 = vadd.f32 0.5, %v396_v44  ;;  %v502_v58 = vmul.f32 %v871_v36, %v500_v48 }
  0x4e   : > { %876 = vlog2.f32 %v453_v51  ;;  %v561_v60 = vadd.f32 %v559_v29, %v557_v52  ;;  %v450_v61 = vadd.f32 0.5, %v448_v53  ;;  %v554_v62 = vmul.f32 0.5, %v873_v41 }
  0x4f   : > { %878 = vlog2.f32 %v507_v56  ;;  %v402_v63 = vadd.f32 %v400_v34, %v398_v57  ;;  %v504_v0 = vadd.f32 0.5, %v502_v58  ;;  %v560_v5 = vmul.f32 %v873_v41, %v531_v59 }
  0x50   : > { %880 = vlog2.f32 %v561_v60  ;;  %v454_v1 = vadd.f32 %v452_v40, %v450_v61  ;;  %v556_v4 = vmul.f32 %v873_v41, %v554_v62 }
  0x51   : > { %882 = vlog2.f32 %v402_v63  ;;  %v508_v6 = vadd.f32 %v506_v54, %v504_v0 }
  0x52   : > { %884 = vlog2.f32 %v454_v1  ;;  %v558_v7 = vadd.f32 0.5, %v556_v4 }
  0x53   : > { %v875_v8 = vpop.eup %874  ;;  %886 = vlog2.f32 %v508_v6 }
  0x54   : > { %v877_v9 = vpop.eup %876  ;;  %v404_v10 = vmul.f32 0.6931472, %v875_v8  ;;  %v562_v11 = vadd.f32 %v560_v5, %v558_v7 }
  0x55   : > { %v879_v12 = vpop.eup %878  ;;  %v456_v14 = vmul.f32 0.6931472, %v877_v9 }
  0x56   : > { %v881_v15 = vpop.eup %880  ;;  %v407_v16 = vadd.f32 %v404_v10, %v1296_v45  ;;  %v510_v18 = vmul.f32 0.6931472, %v879_v12  ;;  %888 = vlog2.f32 %v562_v11 }
  0x57   : > { %v883_v19 = vpop.eup %882  ;;  %v459_v20 = vadd.f32 %v456_v14, %v1298_v46  ;;  %v564_v22 = vmul.f32 0.6931472, %v881_v15  ;;  %v426_v46 = vld [vmem:[#allocation10 + $0x18] sm:$0xff] }
  0x58   : > { %v885_v23 = vpop.eup %884  ;;  %v409_v24 = vsub.f32 %v372_v13, %v407_v16  ;;  %v513_v25 = vadd.f32 %v510_v18, %v1300_v47  ;;  %v406_v27 = vmul.f32 0.6931472, %v883_v19 }
  0x59   : > { %v887_v28 = vpop.eup %886  ;;  %v461_v29 = vsub.f32 %v425_v17, %v459_v20  ;;  %v567_v30 = vadd.f32 %v564_v22, %v1302_v49  ;;  %v458_v45 = vmul.f32 0.6931472, %v885_v23 }
  0x5a   : > { %vm411_vm0 = vcmp.ne.f32.partialorder %v409_v24, %v409_v24  ;;  %v515_v32 = vsub.f32 %v479_v21, %v513_v25  ;;  %v408_v33 = vadd.f32 %v406_v27, %v1304_v50  ;;  %v512_v34 = vmul.f32 0.6931472, %v887_v28 }
  0x5b   : > { %v413_v35 = vsel %vm411_vm0, 0.0, %v409_v24  ;;  %vm463_vm1 = vcmp.ne.f32.partialorder %v461_v29, %v461_v29  ;;  %v569_v36 = vsub.f32 %v533_v26, %v567_v30  ;;  %v460_v47 = vadd.f32 %v458_v45, %v1309_v55  ;;  %v534_v55 = vld [vmem:[#allocation10 + $0x38] sm:$0xff] }
  0x5c   : > { %v889_v38 = vpop.eup %888  ;;  %v465_v39 = vsel %vm463_vm1, 0.0, %v461_v29  ;;  %vm517_vm2 = vcmp.ne.f32.partialorder %v515_v32, %v515_v32  ;;  %v410_v49 = vsub.f32 %v373_v31, %v408_v33  ;;  %v514_v40 = vadd.f32 %v512_v34, %v1314_v2 }
  0x5d   : > { %v467_v41 = vadd.f32 %v465_v39, %v413_v35  ;;  %v519_v42 = vsel %vm517_vm2, 0.0, %v515_v32  ;;  %vm571_vm3 = vcmp.ne.f32.partialorder %v569_v36, %v569_v36  ;;  %v462_v50 = vsub.f32 %v426_v46, %v460_v47 }
  0x5e   : > { %v573_v43 = vsel %vm571_vm3, 0.0, %v569_v36  ;;  %vm412_vm4 = vcmp.ne.f32.partialorder %v410_v49, %v410_v49  ;;  %v516_v44 = vsub.f32 %v480_v37, %v514_v40  ;;  %v566_v48 = vmul.f32 0.6931472, %v889_v38 }
  0x5f   : > { %v521_v51 = vadd.f32 %v519_v42, %v467_v41  ;;  %v414_v52 = vsel %vm412_vm4, 0.0, %v410_v49  ;;  %vm464_vm5 = vcmp.ne.f32.partialorder %v462_v50, %v462_v50 }
  0x60   : > { %v466_v53 = vsel %vm464_vm5, 0.0, %v462_v50  ;;  %vm518_vm6 = vcmp.ne.f32.partialorder %v516_v44, %v516_v44  ;;  %v568_v54 = vadd.f32 %v566_v48, %v1316_v3 }
  0x61   : > { %v575_v2 = vadd.f32 %v573_v43, %v521_v51  ;;  %v468_v56 = vadd.f32 %v466_v53, %v414_v52  ;;  %v520_v57 = vsel %vm518_vm6, 0.0, %v516_v44 }
  0x62   : > { %v570_v58 = vsub.f32 %v534_v55, %v568_v54 }
  0x63   : > { %577 = vst [vmem:[%s358_s21] sm:$0xff] %v575_v2  ;;  %v522_v59 = vadd.f32 %v520_v57, %v468_v56 }
  0x64   : > { %vm572_vm7 = vcmp.ne.f32.partialorder %v570_v58, %v570_v58 }
  0x65   : > { %v574_v60 = vsel %vm572_vm7, 0.0, %v570_v58 }
  0x66   : > { %v576_v61 = vadd.f32 %v574_v60, %v522_v59 }
  0x68   : > { %578 = vst [vmem:[%s358_s21 + $0x8] sm:$0xff] %v576_v61 }
  0x69   : > { %1067 = shalt.err (!%p1064_p13)
}
  0x6a   : > { %771 = dma.vmem_to_hbm [thread:$0]  (%p1260_p0), %s596_s28, 256, %s598_s30, %s580_s6  }
  0x6b PF: > { %s609_s14 = sand.u32 1, %s1110_s18   ;;  %p791_p2 = pnand %p735_p6, %p1267_p5 }
  0x6c   : > { %s610_s29 = scalar_lea.sflag [#allocation4], %s609_s14 }
  0x6d   : > { %p792_p4 = pneg %p791_p2 }
  0x6f   : > { %1105 = dma.done.wait (%p792_p4), %s610_s29, 256  }
  0x70   : > { %1107 = vsyncadd (%p792_p4), %s610_s29, 4294967040  ;;  %s23_s23 = sadd.s32 1, %s1130_s23   ;;  %s1379_s18 = smov %s1114_s19 }
  0x71   : > { %p20_p7 = scmp.ge.s32.totalorder %s23_s23, 4   ;;  %s1380_s19 = smov %s1118_s20 }
  0x72   : > { %s1381_s20 = smov %s1265_s12  ;;  %s1382_s21 = smov %s1126_s22 }
  0x73   : > { %s1383_s22 = smov %s1385_s10  ;;  %22 = sbr.rel (!%p20_p7) target bundleno = 8 (0x8), region = 117 }
  0x78   :  { %616 = vsyncpa [#allocation3], 1 }
  0x79   :  { %618 = vsyncpa [#allocation3 + $0x1], 1 }
  0x7a   :  { %619 = vsyncpa [#allocation6], 1 }
  0x7b   :  { %620 = vsyncpa [#allocation9], 1 }
  0x7c   :  { %621 = vsyncpa [#allocation4], 1 }
  0x7d   :  { %623 = vsyncpa [#allocation4 + $0x1], 1 }

</bundles_post_ra>
